<compile_context>
chip_gen: v6e
topology: v6e:2x2x1
jax: 0.10.0
libtpu: 0.0.40
codegen_flags: <defaults>
</compile_context>

<pallas_src>
import functools

import jax
import jax.numpy as jnp
from jax.experimental import pallas as pl
from jax.experimental.pallas import tpu as pltpu


# ------------------------------ fused kernel --------------------------------

def _fused_forward_kernel(xc_ref, wc_ref, cb_ref, lwt_ref, lb_ref, o_ref):
    """Conv(3x3,pad1)+bias+ReLU -> MaxPool2x2 -> Flatten -> Linear+bias+Sigmoid.

    xc_ref : (4, C_in*9, N*Ho*Wo)  parity-split conv patches (lane = (n,io,jo))
    wc_ref : (C_out, C_in*9)       conv weight, (ci,di,dj)-flattened
    cb_ref : (C_out, 1)            conv bias
    lwt_ref: (C_out, Ho*Wo, O)     linear weight regrouped per conv channel
    lb_ref : (1, O)                linear bias
    o_ref  : (N, O)                final output
    """
    f32 = jnp.float32
    w = wc_ref[...]                                              # (8, 36)

    # Conv GEMM: one lane-dense (8,36)x(36,128) matmul per 2x2-pool parity.
    a0 = jnp.dot(w, xc_ref[0], preferred_element_type=f32)       # (8, 128)
    a1 = jnp.dot(w, xc_ref[1], preferred_element_type=f32)
    a2 = jnp.dot(w, xc_ref[2], preferred_element_type=f32)
    a3 = jnp.dot(w, xc_ref[3], preferred_element_type=f32)

    # MaxPool2d(2) == elementwise max over the parity axis (pure VPU).
    # Per-channel bias add and ReLU commute with the max, so apply them once.
    m = jnp.maximum(jnp.maximum(a0, a1), jnp.maximum(a2, a3))    # (8, 128)
    pooled = jnp.maximum(m + cb_ref[...], 0.0)                   # (8, 128)

    # Linear + Sigmoid.  pooled[c, n*S + s] with s = io*Wo + jo matches
    # PyTorch's Flatten ordering (c, io, jo) once contracted against
    # lwt[c] = lin_w columns belonging to conv channel c.
    n_batch, n_out = o_ref.shape
    c_out = pooled.shape[0]
    s = lwt_ref.shape[1]
    lb = lb_ref[...]                                             # (1, 32)

    rows = []
    for ni in range(n_batch):
        acc = jnp.zeros((1, n_out), f32)
        for ci in range(c_out):
            flat = pooled[ci:ci + 1, ni * s:(ni + 1) * s]        # (1, 64)
            acc = acc + jnp.dot(flat, lwt_ref[ci],
                                preferred_element_type=f32)      # (1, 32)
        rows.append(jax.nn.sigmoid(acc + lb))
    o_ref[...] = jnp.concatenate(rows, axis=0).astype(o_ref.dtype)


# ------------------------------ JAX-side glue --------------------------------

def _conv_pool_patches(x, kh, kw):
    """(N,C,H,W) -> (4, C*kh*kw, N*Ho*Wo) parity-split conv-patch tensor.

    out[p*2+q, ci*kh*kw + di*kw + dj, n*Ho*Wo + io*Wo + jo]
        = xpad[ci, n, 2*io + p + di, 2*jo + q + dj]
    i.e. each leading slice is the im2col RHS of the conv restricted to one
    2x2-maxpool parity (p, q). Stride 1, zero pad 1. Tiny & fully static; XLA
    fuses it into a single fusion feeding the Pallas kernel."""
    n, c, h, w = x.shape
    ho, wo = h // 2, w // 2
    xcm = jnp.transpose(x, (1, 0, 2, 3))                         # (C, N, H, W)
    xpad = jnp.pad(xcm, ((0, 0), (0, 0), (1, 1), (1, 1)))        # (C, N, H+2, W+2)
    taps = [xpad[:, :, di:di + h, dj:dj + w]
            for di in range(kh) for dj in range(kw)]
    pat = jnp.stack(taps, axis=1)                                # (C, 9, N, H, W)
    pat = pat.reshape(c, kh * kw, n, ho, 2, wo, 2)               # (..., io, p, jo, q)
    pat = jnp.transpose(pat, (4, 6, 0, 1, 2, 3, 5))              # (p, q, C, 9, N, io, jo)
    return pat.reshape(4, c * kh * kw, n * ho * wo)              # (4, 36, 128)


def cl_custom_model_forward(x, params):
    """Forward pass of the concrete CL_CustomModel instance.

    x: (N, C_in, H, W) float32 (NCHW, like PyTorch).  returns: (N, O) float32.
    """
    conv_w, conv_b, lin_w, lin_b = (
        params["conv_w"], params["conv_b"], params["lin_w"], params["lin_b"])
    n, c_in, h, w = x.shape
    c_out, _, kh, kw = conv_w.shape
    ho, wo = h // 2, w // 2
    out_features = lin_w.shape[0]

    # Activation re-layout (tiny) + constant-foldable weight reshapes.
    xcols = _conv_pool_patches(x, kh, kw)                        # (4, 36, 128)
    wc = conv_w.reshape(c_out, c_in * kh * kw)                   # (8, 36)
    cb = conv_b.reshape(c_out, 1)                                # (8, 1)
    lwt = jnp.transpose(lin_w.reshape(out_features, c_out, ho * wo),
                        (1, 2, 0))                               # (8, 64, 32)
    lb = lin_b.reshape(1, out_features)                          # (1, 32)

    def full_spec(shape):
        nd = len(shape)
        return pl.BlockSpec(shape, lambda i, _nd=nd: (0,) * _nd)

    operands = (xcols, wc, cb, lwt, lb)
    return pl.pallas_call(
        _fused_forward_kernel,
        out_shape=jax.ShapeDtypeStruct((n, out_features), jnp.float32),
        grid=(1,),    # everything fits in VMEM -> one fused invocation
        in_specs=[full_spec(a.shape) for a in operands],
        out_specs=full_spec((n, out_features)),
        compiler_params=pltpu.CompilerParams(
            dimension_semantics=("arbitrary",)),
    )(*operands)


# TODO(synk): the dynamic layer-registry / nn.Sequential construction from a
# config dict is Python-side plumbing with no kernel equivalent; a fixed
# representative layer list is implemented instead.


# ------------------------------- reference ----------------------------------

def _reference_forward(x, params):
    conv_w, conv_b, lin_w, lin_b = (
        params["conv_w"], params["conv_b"], params["lin_w"], params["lin_b"])
    y = jax.lax.conv_general_dilated(
        x, conv_w, window_strides=(1, 1), padding=[(1, 1), (1, 1)],
        dimension_numbers=("NCHW", "OIHW", "NCHW"))
    y = y + conv_b[None, :, None, None]
    y = jnp.maximum(y, 0.0)
    y = jax.lax.reduce_window(
        y, -jnp.inf, jax.lax.max,
        window_dimensions=(1, 1, 2, 2), window_strides=(1, 1, 2, 2),
        padding="VALID")
    flat = y.reshape(y.shape[0], -1)
    return jax.nn.sigmoid(flat @ lin_w.T + lin_b)


# --------------------------------- main --------------------------------------

if __name__ == "__main__":
    key = jax.random.PRNGKey(0)
    k_x, k_cw, k_cb, k_lw, k_lb = jax.random.split(key, 5)

    N, C_IN, H, W = 2, 4, 16, 16
    C_OUT, K = 8, 3
    HO, WO = H // 2, W // 2
    IN_FEATURES = C_OUT * HO * WO          # 512
    OUT_FEATURES = 32

    x = jax.random.normal(k_x, (N, C_IN, H, W), dtype=jnp.float32)

    params = {
        # PyTorch layouts: Conv2d weight (O, I, kH, kW), Linear weight (out, in)
        "conv_w": 0.1 * jax.random.normal(k_cw, (C_OUT, C_IN, K, K), jnp.float32),
        "conv_b": 0.1 * jax.random.normal(k_cb, (C_OUT,), jnp.float32),
        "lin_w": 0.05 * jax.random.normal(k_lw, (OUT_FEATURES, IN_FEATURES), jnp.float32),
        "lin_b": 0.05 * jax.random.normal(k_lb, (OUT_FEATURES,), jnp.float32),
    }

    fwd = jax.jit(functools.partial(cl_custom_model_forward, params=params))
    out = fwd(x)
    jax.block_until_ready(out)

    ref = _reference_forward(x, params)
    assert out.shape == (N, OUT_FEATURES)
    assert jnp.allclose(out, ref, atol=1e-4, rtol=1e-4), "mismatch vs reference"

    print("KERNEL_OK")
</pallas_src>

<mosaic_0001>
module attributes {stable_mosaic.version = 11 : i64} {
  func.func @_fused_forward_kernel(%arg0: i32, %arg1: memref<4x36x128xf32, #tpu.memory_space<vmem>>, %arg2: memref<8x36xf32, #tpu.memory_space<vmem>>, %arg3: memref<8x1xf32, #tpu.memory_space<vmem>>, %arg4: memref<8x64x32xf32, #tpu.memory_space<vmem>>, %arg5: memref<1x32xf32, #tpu.memory_space<vmem>>, %arg6: memref<2x32xf32, #tpu.memory_space<vmem>>) attributes {dimension_semantics = [#tpu.dimension_semantics<arbitrary>], iteration_bounds = array<i64: 1>, scalar_prefetch = 0 : i64, scratch_operands = 0 : i64, tpu.core_type = #tpu.core_type<tc>, window_params = [{pipeline_mode = #tpu.pipeline_mode<synchronous>, transform_indices = @transform_0, window_bounds = array<i64: 4, 36, 128>}, {pipeline_mode = #tpu.pipeline_mode<synchronous>, transform_indices = @transform_1, window_bounds = array<i64: 8, 36>}, {pipeline_mode = #tpu.pipeline_mode<synchronous>, transform_indices = @transform_2, window_bounds = array<i64: 8, 1>}, {pipeline_mode = #tpu.pipeline_mode<synchronous>, transform_indices = @transform_3, window_bounds = array<i64: 8, 64, 32>}, {pipeline_mode = #tpu.pipeline_mode<synchronous>, transform_indices = @transform_4, window_bounds = array<i64: 1, 32>}, {pipeline_mode = #tpu.pipeline_mode<synchronous>, transform_indices = @transform_5, window_bounds = array<i64: 2, 32>}]} {
    %c0 = arith.constant 0 : index
    %c0_0 = arith.constant 0 : index
    %0 = vector.load %arg2[%c0, %c0_0] : memref<8x36xf32, #tpu.memory_space<vmem>>, vector<8x36xf32>
    %c0_1 = arith.constant 0 : index
    %c0_2 = arith.constant 0 : index
    %c0_3 = arith.constant 0 : index
    %1 = vector.load %arg1[%c0_1, %c0_2, %c0_3] : memref<4x36x128xf32, #tpu.memory_space<vmem>>, vector<1x36x128xf32>
    %2 = vector.shape_cast %1 : vector<1x36x128xf32> to vector<36x128xf32>
    %cst = arith.constant dense<0.000000e+00> : vector<8x128xf32>
    %3 = tpu.matmul %0, %2, %cst {dimension_numbers = #tpu.dot_dimension_numbers<[1], [0], [0], [1], [0, 0, 1, 1], [], []>} : vector<8x36xf32>, vector<36x128xf32>, vector<8x128xf32> -> vector<8x128xf32>
    %c1 = arith.constant 1 : index
    %c0_4 = arith.constant 0 : index
    %c0_5 = arith.constant 0 : index
    %4 = vector.load %arg1[%c1, %c0_4, %c0_5] : memref<4x36x128xf32, #tpu.memory_space<vmem>>, vector<1x36x128xf32>
    %5 = vector.shape_cast %4 : vector<1x36x128xf32> to vector<36x128xf32>
    %cst_6 = arith.constant dense<0.000000e+00> : vector<8x128xf32>
    %6 = tpu.matmul %0, %5, %cst_6 {dimension_numbers = #tpu.dot_dimension_numbers<[1], [0], [0], [1], [0, 0, 1, 1], [], []>} : vector<8x36xf32>, vector<36x128xf32>, vector<8x128xf32> -> vector<8x128xf32>
    %c2 = arith.constant 2 : index
    %c0_7 = arith.constant 0 : index
    %c0_8 = arith.constant 0 : index
    %7 = vector.load %arg1[%c2, %c0_7, %c0_8] : memref<4x36x128xf32, #tpu.memory_space<vmem>>, vector<1x36x128xf32>
    %8 = vector.shape_cast %7 : vector<1x36x128xf32> to vector<36x128xf32>
    %cst_9 = arith.constant dense<0.000000e+00> : vector<8x128xf32>
    %9 = tpu.matmul %0, %8, %cst_9 {dimension_numbers = #tpu.dot_dimension_numbers<[1], [0], [0], [1], [0, 0, 1, 1], [], []>} : vector<8x36xf32>, vector<36x128xf32>, vector<8x128xf32> -> vector<8x128xf32>
    %c3 = arith.constant 3 : index
    %c0_10 = arith.constant 0 : index
    %c0_11 = arith.constant 0 : index
    %10 = vector.load %arg1[%c3, %c0_10, %c0_11] : memref<4x36x128xf32, #tpu.memory_space<vmem>>, vector<1x36x128xf32>
    %11 = vector.shape_cast %10 : vector<1x36x128xf32> to vector<36x128xf32>
    %cst_12 = arith.constant dense<0.000000e+00> : vector<8x128xf32>
    %12 = tpu.matmul %0, %11, %cst_12 {dimension_numbers = #tpu.dot_dimension_numbers<[1], [0], [0], [1], [0, 0, 1, 1], [], []>} : vector<8x36xf32>, vector<36x128xf32>, vector<8x128xf32> -> vector<8x128xf32>
    %13 = arith.maximumf %3, %6 : vector<8x128xf32>
    %14 = arith.maximumf %9, %12 : vector<8x128xf32>
    %15 = arith.maximumf %13, %14 : vector<8x128xf32>
    %c0_13 = arith.constant 0 : index
    %c0_14 = arith.constant 0 : index
    %16 = vector.load %arg3[%c0_13, %c0_14] : memref<8x1xf32, #tpu.memory_space<vmem>>, vector<8x1xf32>
    %17 = vector.broadcast %16 : vector<8x1xf32> to vector<8x128xf32>
    %18 = arith.addf %15, %17 : vector<8x128xf32>
    %cst_15 = arith.constant 0.000000e+00 : f32
    %19 = vector.broadcast %cst_15 : f32 to vector<8x128xf32>
    %20 = arith.maximumf %18, %19 : vector<8x128xf32>
    %c0_16 = arith.constant 0 : index
    %c0_17 = arith.constant 0 : index
    %21 = vector.load %arg5[%c0_16, %c0_17] : memref<1x32xf32, #tpu.memory_space<vmem>>, vector<1x32xf32>
    %cst_18 = arith.constant 0.000000e+00 : f32
    %22 = vector.broadcast %cst_18 : f32 to vector<1x32xf32>
    %23 = vector.extract_strided_slice %20 {offsets = [0, 0], sizes = [1, 64], strides = [1, 1]} : vector<8x128xf32> to vector<1x64xf32>
    %c0_19 = arith.constant 0 : index
    %c0_20 = arith.constant 0 : index
    %c0_21 = arith.constant 0 : index
    %24 = vector.load %arg4[%c0_19, %c0_20, %c0_21] : memref<8x64x32xf32, #tpu.memory_space<vmem>>, vector<1x64x32xf32>
    %25 = vector.shape_cast %24 : vector<1x64x32xf32> to vector<64x32xf32>
    %cst_22 = arith.constant dense<0.000000e+00> : vector<1x32xf32>
    %26 = tpu.matmul %23, %25, %cst_22 {dimension_numbers = #tpu.dot_dimension_numbers<[1], [0], [0], [1], [0, 0, 1, 1], [], []>} : vector<1x64xf32>, vector<64x32xf32>, vector<1x32xf32> -> vector<1x32xf32>
    %27 = arith.addf %22, %26 : vector<1x32xf32>
    %28 = vector.extract_strided_slice %20 {offsets = [1, 0], sizes = [1, 64], strides = [1, 1]} : vector<8x128xf32> to vector<1x64xf32>
    %c1_23 = arith.constant 1 : index
    %c0_24 = arith.constant 0 : index
    %c0_25 = arith.constant 0 : index
    %29 = vector.load %arg4[%c1_23, %c0_24, %c0_25] : memref<8x64x32xf32, #tpu.memory_space<vmem>>, vector<1x64x32xf32>
    %30 = vector.shape_cast %29 : vector<1x64x32xf32> to vector<64x32xf32>
    %cst_26 = arith.constant dense<0.000000e+00> : vector<1x32xf32>
    %31 = tpu.matmul %28, %30, %cst_26 {dimension_numbers = #tpu.dot_dimension_numbers<[1], [0], [0], [1], [0, 0, 1, 1], [], []>} : vector<1x64xf32>, vector<64x32xf32>, vector<1x32xf32> -> vector<1x32xf32>
    %32 = arith.addf %27, %31 : vector<1x32xf32>
    %33 = vector.extract_strided_slice %20 {offsets = [2, 0], sizes = [1, 64], strides = [1, 1]} : vector<8x128xf32> to vector<1x64xf32>
    %c2_27 = arith.constant 2 : index
    %c0_28 = arith.constant 0 : index
    %c0_29 = arith.constant 0 : index
    %34 = vector.load %arg4[%c2_27, %c0_28, %c0_29] : memref<8x64x32xf32, #tpu.memory_space<vmem>>, vector<1x64x32xf32>
    %35 = vector.shape_cast %34 : vector<1x64x32xf32> to vector<64x32xf32>
    %cst_30 = arith.constant dense<0.000000e+00> : vector<1x32xf32>
    %36 = tpu.matmul %33, %35, %cst_30 {dimension_numbers = #tpu.dot_dimension_numbers<[1], [0], [0], [1], [0, 0, 1, 1], [], []>} : vector<1x64xf32>, vector<64x32xf32>, vector<1x32xf32> -> vector<1x32xf32>
    %37 = arith.addf %32, %36 : vector<1x32xf32>
    %38 = vector.extract_strided_slice %20 {offsets = [3, 0], sizes = [1, 64], strides = [1, 1]} : vector<8x128xf32> to vector<1x64xf32>
    %c3_31 = arith.constant 3 : index
    %c0_32 = arith.constant 0 : index
    %c0_33 = arith.constant 0 : index
    %39 = vector.load %arg4[%c3_31, %c0_32, %c0_33] : memref<8x64x32xf32, #tpu.memory_space<vmem>>, vector<1x64x32xf32>
    %40 = vector.shape_cast %39 : vector<1x64x32xf32> to vector<64x32xf32>
    %cst_34 = arith.constant dense<0.000000e+00> : vector<1x32xf32>
    %41 = tpu.matmul %38, %40, %cst_34 {dimension_numbers = #tpu.dot_dimension_numbers<[1], [0], [0], [1], [0, 0, 1, 1], [], []>} : vector<1x64xf32>, vector<64x32xf32>, vector<1x32xf32> -> vector<1x32xf32>
    %42 = arith.addf %37, %41 : vector<1x32xf32>
    %43 = vector.extract_strided_slice %20 {offsets = [4, 0], sizes = [1, 64], strides = [1, 1]} : vector<8x128xf32> to vector<1x64xf32>
    %c4 = arith.constant 4 : index
    %c0_35 = arith.constant 0 : index
    %c0_36 = arith.constant 0 : index
    %44 = vector.load %arg4[%c4, %c0_35, %c0_36] : memref<8x64x32xf32, #tpu.memory_space<vmem>>, vector<1x64x32xf32>
    %45 = vector.shape_cast %44 : vector<1x64x32xf32> to vector<64x32xf32>
    %cst_37 = arith.constant dense<0.000000e+00> : vector<1x32xf32>
    %46 = tpu.matmul %43, %45, %cst_37 {dimension_numbers = #tpu.dot_dimension_numbers<[1], [0], [0], [1], [0, 0, 1, 1], [], []>} : vector<1x64xf32>, vector<64x32xf32>, vector<1x32xf32> -> vector<1x32xf32>
    %47 = arith.addf %42, %46 : vector<1x32xf32>
    %48 = vector.extract_strided_slice %20 {offsets = [5, 0], sizes = [1, 64], strides = [1, 1]} : vector<8x128xf32> to vector<1x64xf32>
    %c5 = arith.constant 5 : index
    %c0_38 = arith.constant 0 : index
    %c0_39 = arith.constant 0 : index
    %49 = vector.load %arg4[%c5, %c0_38, %c0_39] : memref<8x64x32xf32, #tpu.memory_space<vmem>>, vector<1x64x32xf32>
    %50 = vector.shape_cast %49 : vector<1x64x32xf32> to vector<64x32xf32>
    %cst_40 = arith.constant dense<0.000000e+00> : vector<1x32xf32>
    %51 = tpu.matmul %48, %50, %cst_40 {dimension_numbers = #tpu.dot_dimension_numbers<[1], [0], [0], [1], [0, 0, 1, 1], [], []>} : vector<1x64xf32>, vector<64x32xf32>, vector<1x32xf32> -> vector<1x32xf32>
    %52 = arith.addf %47, %51 : vector<1x32xf32>
    %53 = vector.extract_strided_slice %20 {offsets = [6, 0], sizes = [1, 64], strides = [1, 1]} : vector<8x128xf32> to vector<1x64xf32>
    %c6 = arith.constant 6 : index
    %c0_41 = arith.constant 0 : index
    %c0_42 = arith.constant 0 : index
    %54 = vector.load %arg4[%c6, %c0_41, %c0_42] : memref<8x64x32xf32, #tpu.memory_space<vmem>>, vector<1x64x32xf32>
    %55 = vector.shape_cast %54 : vector<1x64x32xf32> to vector<64x32xf32>
    %cst_43 = arith.constant dense<0.000000e+00> : vector<1x32xf32>
    %56 = tpu.matmul %53, %55, %cst_43 {dimension_numbers = #tpu.dot_dimension_numbers<[1], [0], [0], [1], [0, 0, 1, 1], [], []>} : vector<1x64xf32>, vector<64x32xf32>, vector<1x32xf32> -> vector<1x32xf32>
    %57 = arith.addf %52, %56 : vector<1x32xf32>
    %58 = vector.extract_strided_slice %20 {offsets = [7, 0], sizes = [1, 64], strides = [1, 1]} : vector<8x128xf32> to vector<1x64xf32>
    %c7 = arith.constant 7 : index
    %c0_44 = arith.constant 0 : index
    %c0_45 = arith.constant 0 : index
    %59 = vector.load %arg4[%c7, %c0_44, %c0_45] : memref<8x64x32xf32, #tpu.memory_space<vmem>>, vector<1x64x32xf32>
    %60 = vector.shape_cast %59 : vector<1x64x32xf32> to vector<64x32xf32>
    %cst_46 = arith.constant dense<0.000000e+00> : vector<1x32xf32>
    %61 = tpu.matmul %58, %60, %cst_46 {dimension_numbers = #tpu.dot_dimension_numbers<[1], [0], [0], [1], [0, 0, 1, 1], [], []>} : vector<1x64xf32>, vector<64x32xf32>, vector<1x32xf32> -> vector<1x32xf32>
    %62 = arith.addf %57, %61 : vector<1x32xf32>
    %63 = arith.addf %62, %21 : vector<1x32xf32>
    %64 = arith.negf %63 : vector<1x32xf32>
    %65 = math.exp %64 : vector<1x32xf32>
    %cst_47 = arith.constant 1.000000e+00 : f32
    %66 = vector.broadcast %cst_47 : f32 to vector<1x32xf32>
    %67 = arith.addf %66, %65 : vector<1x32xf32>
    %68 = arith.divf %66, %67 : vector<1x32xf32>
    %cst_48 = arith.constant 0.000000e+00 : f32
    %69 = vector.broadcast %cst_48 : f32 to vector<1x32xf32>
    %70 = vector.extract_strided_slice %20 {offsets = [0, 64], sizes = [1, 64], strides = [1, 1]} : vector<8x128xf32> to vector<1x64xf32>
    %c0_49 = arith.constant 0 : index
    %c0_50 = arith.constant 0 : index
    %c0_51 = arith.constant 0 : index
    %71 = vector.load %arg4[%c0_49, %c0_50, %c0_51] : memref<8x64x32xf32, #tpu.memory_space<vmem>>, vector<1x64x32xf32>
    %72 = vector.shape_cast %71 : vector<1x64x32xf32> to vector<64x32xf32>
    %cst_52 = arith.constant dense<0.000000e+00> : vector<1x32xf32>
    %73 = tpu.matmul %70, %72, %cst_52 {dimension_numbers = #tpu.dot_dimension_numbers<[1], [0], [0], [1], [0, 0, 1, 1], [], []>} : vector<1x64xf32>, vector<64x32xf32>, vector<1x32xf32> -> vector<1x32xf32>
    %74 = arith.addf %69, %73 : vector<1x32xf32>
    %75 = vector.extract_strided_slice %20 {offsets = [1, 64], sizes = [1, 64], strides = [1, 1]} : vector<8x128xf32> to vector<1x64xf32>
    %c1_53 = arith.constant 1 : index
    %c0_54 = arith.constant 0 : index
    %c0_55 = arith.constant 0 : index
    %76 = vector.load %arg4[%c1_53, %c0_54, %c0_55] : memref<8x64x32xf32, #tpu.memory_space<vmem>>, vector<1x64x32xf32>
    %77 = vector.shape_cast %76 : vector<1x64x32xf32> to vector<64x32xf32>
    %cst_56 = arith.constant dense<0.000000e+00> : vector<1x32xf32>
    %78 = tpu.matmul %75, %77, %cst_56 {dimension_numbers = #tpu.dot_dimension_numbers<[1], [0], [0], [1], [0, 0, 1, 1], [], []>} : vector<1x64xf32>, vector<64x32xf32>, vector<1x32xf32> -> vector<1x32xf32>
    %79 = arith.addf %74, %78 : vector<1x32xf32>
    %80 = vector.extract_strided_slice %20 {offsets = [2, 64], sizes = [1, 64], strides = [1, 1]} : vector<8x128xf32> to vector<1x64xf32>
    %c2_57 = arith.constant 2 : index
    %c0_58 = arith.constant 0 : index
    %c0_59 = arith.constant 0 : index
    %81 = vector.load %arg4[%c2_57, %c0_58, %c0_59] : memref<8x64x32xf32, #tpu.memory_space<vmem>>, vector<1x64x32xf32>
    %82 = vector.shape_cast %81 : vector<1x64x32xf32> to vector<64x32xf32>
    %cst_60 = arith.constant dense<0.000000e+00> : vector<1x32xf32>
    %83 = tpu.matmul %80, %82, %cst_60 {dimension_numbers = #tpu.dot_dimension_numbers<[1], [0], [0], [1], [0, 0, 1, 1], [], []>} : vector<1x64xf32>, vector<64x32xf32>, vector<1x32xf32> -> vector<1x32xf32>
    %84 = arith.addf %79, %83 : vector<1x32xf32>
    %85 = vector.extract_strided_slice %20 {offsets = [3, 64], sizes = [1, 64], strides = [1, 1]} : vector<8x128xf32> to vector<1x64xf32>
    %c3_61 = arith.constant 3 : index
    %c0_62 = arith.constant 0 : index
    %c0_63 = arith.constant 0 : index
    %86 = vector.load %arg4[%c3_61, %c0_62, %c0_63] : memref<8x64x32xf32, #tpu.memory_space<vmem>>, vector<1x64x32xf32>
    %87 = vector.shape_cast %86 : vector<1x64x32xf32> to vector<64x32xf32>
    %cst_64 = arith.constant dense<0.000000e+00> : vector<1x32xf32>
    %88 = tpu.matmul %85, %87, %cst_64 {dimension_numbers = #tpu.dot_dimension_numbers<[1], [0], [0], [1], [0, 0, 1, 1], [], []>} : vector<1x64xf32>, vector<64x32xf32>, vector<1x32xf32> -> vector<1x32xf32>
    %89 = arith.addf %84, %88 : vector<1x32xf32>
    %90 = vector.extract_strided_slice %20 {offsets = [4, 64], sizes = [1, 64], strides = [1, 1]} : vector<8x128xf32> to vector<1x64xf32>
    %c4_65 = arith.constant 4 : index
    %c0_66 = arith.constant 0 : index
    %c0_67 = arith.constant 0 : index
    %91 = vector.load %arg4[%c4_65, %c0_66, %c0_67] : memref<8x64x32xf32, #tpu.memory_space<vmem>>, vector<1x64x32xf32>
    %92 = vector.shape_cast %91 : vector<1x64x32xf32> to vector<64x32xf32>
    %cst_68 = arith.constant dense<0.000000e+00> : vector<1x32xf32>
    %93 = tpu.matmul %90, %92, %cst_68 {dimension_numbers = #tpu.dot_dimension_numbers<[1], [0], [0], [1], [0, 0, 1, 1], [], []>} : vector<1x64xf32>, vector<64x32xf32>, vector<1x32xf32> -> vector<1x32xf32>
    %94 = arith.addf %89, %93 : vector<1x32xf32>
    %95 = vector.extract_strided_slice %20 {offsets = [5, 64], sizes = [1, 64], strides = [1, 1]} : vector<8x128xf32> to vector<1x64xf32>
    %c5_69 = arith.constant 5 : index
    %c0_70 = arith.constant 0 : index
    %c0_71 = arith.constant 0 : index
    %96 = vector.load %arg4[%c5_69, %c0_70, %c0_71] : memref<8x64x32xf32, #tpu.memory_space<vmem>>, vector<1x64x32xf32>
    %97 = vector.shape_cast %96 : vector<1x64x32xf32> to vector<64x32xf32>
    %cst_72 = arith.constant dense<0.000000e+00> : vector<1x32xf32>
    %98 = tpu.matmul %95, %97, %cst_72 {dimension_numbers = #tpu.dot_dimension_numbers<[1], [0], [0], [1], [0, 0, 1, 1], [], []>} : vector<1x64xf32>, vector<64x32xf32>, vector<1x32xf32> -> vector<1x32xf32>
    %99 = arith.addf %94, %98 : vector<1x32xf32>
    %100 = vector.extract_strided_slice %20 {offsets = [6, 64], sizes = [1, 64], strides = [1, 1]} : vector<8x128xf32> to vector<1x64xf32>
    %c6_73 = arith.constant 6 : index
    %c0_74 = arith.constant 0 : index
    %c0_75 = arith.constant 0 : index
    %101 = vector.load %arg4[%c6_73, %c0_74, %c0_75] : memref<8x64x32xf32, #tpu.memory_space<vmem>>, vector<1x64x32xf32>
    %102 = vector.shape_cast %101 : vector<1x64x32xf32> to vector<64x32xf32>
    %cst_76 = arith.constant dense<0.000000e+00> : vector<1x32xf32>
    %103 = tpu.matmul %100, %102, %cst_76 {dimension_numbers = #tpu.dot_dimension_numbers<[1], [0], [0], [1], [0, 0, 1, 1], [], []>} : vector<1x64xf32>, vector<64x32xf32>, vector<1x32xf32> -> vector<1x32xf32>
    %104 = arith.addf %99, %103 : vector<1x32xf32>
    %105 = vector.extract_strided_slice %20 {offsets = [7, 64], sizes = [1, 64], strides = [1, 1]} : vector<8x128xf32> to vector<1x64xf32>
    %c7_77 = arith.constant 7 : index
    %c0_78 = arith.constant 0 : index
    %c0_79 = arith.constant 0 : index
    %106 = vector.load %arg4[%c7_77, %c0_78, %c0_79] : memref<8x64x32xf32, #tpu.memory_space<vmem>>, vector<1x64x32xf32>
    %107 = vector.shape_cast %106 : vector<1x64x32xf32> to vector<64x32xf32>
    %cst_80 = arith.constant dense<0.000000e+00> : vector<1x32xf32>
    %108 = tpu.matmul %105, %107, %cst_80 {dimension_numbers = #tpu.dot_dimension_numbers<[1], [0], [0], [1], [0, 0, 1, 1], [], []>} : vector<1x64xf32>, vector<64x32xf32>, vector<1x32xf32> -> vector<1x32xf32>
    %109 = arith.addf %104, %108 : vector<1x32xf32>
    %110 = arith.addf %109, %21 : vector<1x32xf32>
    %111 = arith.negf %110 : vector<1x32xf32>
    %112 = math.exp %111 : vector<1x32xf32>
    %cst_81 = arith.constant 1.000000e+00 : f32
    %113 = vector.broadcast %cst_81 : f32 to vector<1x32xf32>
    %114 = arith.addf %113, %112 : vector<1x32xf32>
    %115 = arith.divf %113, %114 : vector<1x32xf32>
    %116 = tpu.concatenate %68, %115 in 0 : vector<1x32xf32>, vector<1x32xf32> -> vector<2x32xf32>
    %c0_82 = arith.constant 0 : index
    %c0_83 = arith.constant 0 : index
    %117 = vector.load %arg6[%c0_82, %c0_83] : memref<2x32xf32, #tpu.memory_space<vmem>>, vector<2x32xf32>
    tpu.vector_store %arg6[%c0_82, %c0_83], %116 {strides = array<i32>} : memref<2x32xf32, #tpu.memory_space<vmem>>, vector<2x32xf32>,
    return
  }
  func.func @transform_0(%arg0: i32) -> (i32, i32, i32) {
    %c0_i32 = arith.constant 0 : i32
    %c0_i32_0 = arith.constant 0 : i32
    %c0_i32_1 = arith.constant 0 : i32
    %c0_i32_2 = arith.constant 0 : i32
    return %c0_i32, %c0_i32_0, %c0_i32_1 : i32, i32, i32
  }
  func.func @transform_1(%arg0: i32) -> (i32, i32) {
    %c0_i32 = arith.constant 0 : i32
    %c0_i32_0 = arith.constant 0 : i32
    %c0_i32_1 = arith.constant 0 : i32
    return %c0_i32, %c0_i32_0 : i32, i32
  }
  func.func @transform_2(%arg0: i32) -> (i32, i32) {
    %c0_i32 = arith.constant 0 : i32
    %c0_i32_0 = arith.constant 0 : i32
    %c0_i32_1 = arith.constant 0 : i32
    return %c0_i32, %c0_i32_0 : i32, i32
  }
  func.func @transform_3(%arg0: i32) -> (i32, i32, i32) {
    %c0_i32 = arith.constant 0 : i32
    %c0_i32_0 = arith.constant 0 : i32
    %c0_i32_1 = arith.constant 0 : i32
    %c0_i32_2 = arith.constant 0 : i32
    return %c0_i32, %c0_i32_0, %c0_i32_1 : i32, i32, i32
  }
  func.func @transform_4(%arg0: i32) -> (i32, i32) {
    %c0_i32 = arith.constant 0 : i32
    %c0_i32_0 = arith.constant 0 : i32
    %c0_i32_1 = arith.constant 0 : i32
    return %c0_i32, %c0_i32_0 : i32, i32
  }
  func.func @transform_5(%arg0: i32) -> (i32, i32) {
    %c0_i32 = arith.constant 0 : i32
    %c0_i32_0 = arith.constant 0 : i32
    %c0_i32_1 = arith.constant 0 : i32
    return %c0_i32, %c0_i32_0 : i32, i32
  }
}

</mosaic_0001>

<bundles_post_ra>
// kernel: cl_custom_model_forward.1
= control target key start
LH: loop header
LB: loop body
LE: loop exit
PB: predicated region body
PF: predicated region fallthrough
CT: control target
= control target key end

     0   :  { %vm31_vm0 = vcmask 1043456   ;;  %v2306_v2 = vmov 0.0   ;;  %s3108_s0 = inlined_call_operand.vmem [shape: f32[4,36,128], index: 0, kind: input, shape index: {}]   ;;  %s3109_s1 = inlined_call_operand.vmem [shape: f32[8,36], index: 1, kind: input, shape index: {}]   ;;  %s3110_s2 = inlined_call_operand.vmem [shape: f32[8,1], index: 2, kind: input, shape index: {}]   ;;  %s3111_s3 = inlined_call_operand.vmem [shape: f32[8,64,32], index: 3, kind: input, shape index: {}]   ;;  %s3112_s4 = inlined_call_operand.vmem [shape: f32[1,32], index: 4, kind: input, shape index: {}]   ;;  %s3113_s5 = inlined_call_operand.hbm [shape: f32[2,32], index: 5, kind: output, shape index: {}]  }
   0x1   :  { %v26_v0 = vld [vmem:[%s3108_s0 + $0x20] sm:$0xf]  ;;  %v1655_v1 = vld [vmem:[%s3108_s0 + $0x48] sm:$0xf]  ;;  %1914 = vmatprep.subr.mxu0 %v2306_v2  ;;  %1927 = vmatprep.subr.mxu1 %v2306_v2  ;;  %v25_v3 = vld [vmem:[%s3108_s0 + $0x18] sm:$0xff] }
   0x2   :  { %v1654_v4 = vld [vmem:[%s3108_s0 + $0x40] sm:$0xff]  ;;  %1915 = vmatpush3.msk.msra.mxu0 %vm31_vm0, %v26_v0  ;;  %1928 = vmatpush3.msk.msra.mxu1 %vm31_vm0, %v1655_v1  ;;  %v24_v5 = vld [vmem:[%s3108_s0 + $0x10] sm:$0xff]  ;;  %v1653_v6 = vld [vmem:[%s3108_s0 + $0x38] sm:$0xff] }
   0x3   :  { %1916 = vmatprep.subr.mxu0 %v2306_v2  ;;  %1929 = vmatprep.subr.mxu1 %v2306_v2  ;;  %v23_v7 = vld [vmem:[%s3108_s0 + $0x8] sm:$0xff]  ;;  %v1652_v8 = vld [vmem:[%s3108_s0 + $0x30] sm:$0xff]  ;;  %v22_v9 = vld [vmem:[%s3108_s0] sm:$0xff] }
   0x4   :  { %1917 = vmatpush3.msra.mxu0 %v25_v3  ;;  %1930 = vmatpush3.msra.mxu1 %v1654_v4 }
   0x5   :  { %1918 = vmatprep.subr.mxu0 %v2306_v2  ;;  %1931 = vmatprep.subr.mxu1 %v2306_v2 }
   0x6   :  { %1919 = vmatpush3.msra.mxu0 %v24_v5  ;;  %1932 = vmatpush3.msra.mxu1 %v1653_v6 }
   0x7   :  { %1920 = vmatprep.subr.mxu0 %v2306_v2  ;;  %1933 = vmatprep.subr.mxu1 %v2306_v2 }
   0x8   :  { %10 = vsyncpa [#allocation3], 0  ;;  %1921 = vmatpush3.msra.mxu0 %v23_v7  ;;  %1934 = vmatpush3.msra.mxu1 %v1652_v8  ;;  %v1651_v10 = vld [vmem:[%s3108_s0 + $0x28] sm:$0xff]  ;;  %v21_v11 = vld [vmem:[%s3109_s1] sm:$0xff]  ;;  %vm27_vm1 = vcmask 293888   ;;  %vm2307_vm2 = vmmov 0  }
   0x9   :  { %1922 = vmatprep.subr.mxu0 %v2306_v2  ;;  %1935 = vmatprep.subr.mxu1 %v2306_v2  ;;  %v1662_v12 = vld [vmem:[%s3108_s0 + $0x70] sm:$0xf]  ;;  %v1669_v13 = vld [vmem:[%s3108_s0 + $0x98] sm:$0xf]  ;;  %v1661_v14 = vld [vmem:[%s3108_s0 + $0x68] sm:$0xff]  ;;  %v2308_v23 = vmov 0  }
   0xa   :  { %1923 = vmatpush3.msra.mxu0 %v22_v9  ;;  %1924 = vmatprep.mubr.msk.f32.mxu0 %vm2307_vm2, %v2306_v2  ;;  %v1668_v15 = vld [vmem:[%s3108_s0 + $0x90] sm:$0xff]  ;;  %v1660_v16 = vld [vmem:[%s3108_s0 + $0x60] sm:$0xff]  ;;  %v1667_v17 = vld [vmem:[%s3108_s0 + $0x88] sm:$0xff]  ;;  %vm373_vm3 = vcmask 523264   ;;  %s2309_s15 = smov 64   ;;  %vm1631_vm4 = vcmask 1040384  }
   0xb   :  { %1936 = vmatpush3.msra.mxu1 %v1651_v10  ;;  %1937 = vmatprep.mubr.msk.f32.mxu1 %vm2307_vm2, %v2306_v2  ;;  %v1659_v18 = vld [vmem:[%s3108_s0 + $0x58] sm:$0xff]  ;;  %v1666_v19 = vld [vmem:[%s3108_s0 + $0x80] sm:$0xff]  ;;  %v1658_v20 = vld [vmem:[%s3108_s0 + $0x50] sm:$0xff]  ;;  %vm1633_vm5 = vcmask 254976  }
   0xc   :  { %1925 = vmatmul.mubr.msk.f32.vlgmr.msra.gmra.mxu0 %vm27_vm1, %v21_v11  ;;  %1938 = vmatmul.mubr.msk.f32.vlgmr.msra.gmra.mxu1 %vm27_vm1, %v21_v11  ;;  %v1665_v21 = vld [vmem:[%s3108_s0 + $0x78] sm:$0xff]  ;;  %v345_v22 = vld [vmem:[%s3110_s2] sm:$0xff]  ;;  %v2462_v26 = vld [vmem:[%s3111_s3 + $0x30] sm:$0xff] }
   0xd   :  { %1940 = vmatprep.subr.mxu0 %v2306_v2  ;;  %1953 = vmatprep.subr.mxu1 %v2306_v2  ;;  %v2452_v24 = vld [vmem:[%s3111_s3 + $0x38] sm:$0xff]  ;;  %v2469_v27 = vld [vmem:[%s3111_s3 + $0x70] sm:$0xff]  ;;  %v2476_v28 = vld [vmem:[%s3111_s3 + $0x28] sm:$0xff] }
   0xe   :  { %1941 = vmatpush3.msk.msra.mxu0 %vm31_vm0, %v1662_v12  ;;  %1954 = vmatpush3.msk.msra.mxu1 %vm31_vm0, %v1669_v13  ;;  %v2457_v25 = vld [vmem:[%s3111_s3 + $0x78] sm:$0xff]  ;;  %v2481_v29 = vld [vmem:[%s3111_s3 + $0x68] sm:$0xff]  ;;  %v2490_v30 = vld [vmem:[%s3111_s3 + $0x20] sm:$0xff] }
   0xf   :  { %1942 = vmatprep.subr.mxu0 %v2306_v2  ;;  %1955 = vmatprep.subr.mxu1 %v2306_v2  ;;  %v2501_v31 = vld [vmem:[%s3111_s3 + $0x60] sm:$0xff]  ;;  %v2506_v32 = vld [vmem:[%s3111_s3 + $0x18] sm:$0xff]  ;;  %v2520_v34 = vld [vmem:[%s3111_s3 + $0x10] sm:$0xff] }
  0x10   :  { %1943 = vmatpush3.msra.mxu0 %v1661_v14  ;;  %1956 = vmatpush3.msra.mxu1 %v1668_v15  ;;  %v2515_v33 = vld [vmem:[%s3111_s3 + $0x58] sm:$0xff]  ;;  %v2529_v35 = vld [vmem:[%s3111_s3 + $0x50] sm:$0xff]  ;;  %v2534_v36 = vld [vmem:[%s3111_s3 + $0x8] sm:$0xff] }
  0x11   :  { %1944 = vmatprep.subr.mxu0 %v2306_v2  ;;  %1957 = vmatprep.subr.mxu1 %v2306_v2  ;;  %v2543_v37 = vld [vmem:[%s3111_s3 + $0x48] sm:$0xff]  ;;  %v2548_v38 = vld [vmem:[%s3111_s3] sm:$0xff]  ;;  %v2566_v54 = vld [vmem:[%s3111_s3 + $0xf8] sm:$0xff] }
  0x12   :  { %1945 = vmatpush3.msra.mxu0 %v1660_v16  ;;  %1958 = vmatpush3.msra.mxu1 %v1667_v17  ;;  %v2555_v39 = vld [vmem:[%s3111_s3 + $0x40] sm:$0xff]  ;;  %v2575_v55 = vld [vmem:[%s3111_s3 + $0xf0] sm:$0xff]  ;;  %v2582_v57 = vld [vmem:[%s3111_s3 + $0xb8] sm:$0xff] }
  0x13   :  { %1946 = vmatprep.subr.mxu0 %v2306_v2  ;;  %1959 = vmatprep.subr.mxu1 %v2306_v2  ;;  %v2594_v59 = vld [vmem:[%s3111_s3 + $0xb0] sm:$0xff]  ;;  %v2599_v60 = vld [vmem:[%s3111_s3 + $0xe8] sm:$0xff]  ;;  %v2608_v61 = vld [vmem:[%s3111_s3 + $0xe0] sm:$0xff] }
  0x14   :  { %1947 = vmatpush3.msra.mxu0 %v1659_v18  ;;  %1960 = vmatpush3.msra.mxu1 %v1666_v19  ;;  %v2616_v63 = vld [vmem:[%s3111_s3 + $0xa8] sm:$0xff]  ;;  %v2626_v1 = vld [vmem:[%s3111_s3 + $0xa0] sm:$0xff]  ;;  %v2631_v3 = vld [vmem:[%s3111_s3 + $0xd8] sm:$0xff] }
  0x15   :  { %1948 = vmatprep.subr.mxu0 %v2306_v2  ;;  %1961 = vmatprep.subr.mxu1 %v2306_v2  ;;  %v2642_v4 = vld [vmem:[%s3111_s3 + $0xd0] sm:$0xff]  ;;  %v2650_v6 = vld [vmem:[%s3111_s3 + $0x98] sm:$0xff]  ;;  %v2667_v9 = vld [vmem:[%s3111_s3 + $0xc8] sm:$0xff] }
  0x16   :  { %1949 = vmatpush3.msra.mxu0 %v1658_v20  ;;  %1950 = vmatprep.mubr.msk.f32.mxu0 %vm2307_vm2, %v2306_v2  ;;  %v2662_v8 = vld [vmem:[%s3111_s3 + $0x90] sm:$0xff]  ;;  %v2678_v10 = vld [vmem:[%s3111_s3 + $0xc0] sm:$0xff]  ;;  %v2686_v12 = vld [vmem:[%s3111_s3 + $0x88] sm:$0xff] }
  0x17   :  { %1962 = vmatpush3.msra.mxu1 %v1665_v21  ;;  %1963 = vmatprep.mubr.msk.f32.mxu1 %vm2307_vm2, %v2306_v2  ;;  %v2697_v13 = vld [vmem:[%s3111_s3 + $0x80] sm:$0xff]  ;;  %v2704_v14 = vld [vmem:[%s3111_s3 + $0x178] sm:$0xff]  ;;  %v2719_v16 = vld [vmem:[%s3111_s3 + $0x170] sm:$0xff] }
  0x18   :  { %1951 = vmatmul.mubr.msk.f32.vlgmr.msra.gmra.mxu0 %vm27_vm1, %v21_v11  ;;  %1964 = vmatmul.mubr.msk.f32.vlgmr.msra.gmra.mxu1 %vm27_vm1, %v21_v11  ;;  %v2714_v15 = vld [vmem:[%s3111_s3 + $0x138] sm:$0xff]  ;;  %v2728_v17 = vld [vmem:[%s3111_s3 + $0x130] sm:$0xff]  ;;  %v2733_v18 = vld [vmem:[%s3111_s3 + $0x168] sm:$0xff] }
  0x19   :  { %2275 = vset.pattern.permute.xlu0 %v2308_v23  ;;  %1985 = vmatprep.subr.mxu1 %v2306_v2  ;;  %v2742_v19 = vld [vmem:[%s3111_s3 + $0x128] sm:$0xff]  ;;  %v2747_v20 = vld [vmem:[%s3111_s3 + $0x160] sm:$0xff]  ;;  %v2770_v23 = vld [vmem:[%s3111_s3 + $0x118] sm:$0xff] }
  0x1a   :  { %348 = vperm.xlu0 %2275, %v345_v22   ;;  %1966 = vmatprep.subr.mxu0 %v2306_v2  ;;  %v2756_v21 = vld [vmem:[%s3111_s3 + $0x120] sm:$0xff]  ;;  %v2761_v22 = vld [vmem:[%s3111_s3 + $0x158] sm:$0xff] }
  0x1b   :  { %2001 = vmatprep.mubr.msk.f32.mxu1 %vm2307_vm2, %v2306_v2  ;;  %1982 = vmatprep.mubr.msk.f32.mxu0 %vm2307_vm2, %v2306_v2 }
  0x1c   :  { %1986 = vmatpush3.msra.mxu1 %v2452_v24  ;;  %1967 = vmatpush3.msra.mxu0 %v2457_v25 }
  0x1d   :  { %1987 = vmatprep.subr.mxu1 %v2306_v2  ;;  %1968 = vmatprep.subr.mxu0 %v2306_v2 }
  0x1e   :  { %1988 = vmatpush3.msra.mxu1 %v2462_v26  ;;  %1969 = vmatpush3.msra.mxu0 %v2469_v27 }
  0x1f   :  { %1989 = vmatprep.subr.mxu1 %v2306_v2  ;;  %1970 = vmatprep.subr.mxu0 %v2306_v2 }
  0x20   :  { %1990 = vmatpush3.msra.mxu1 %v2476_v28  ;;  %1971 = vmatpush3.msra.mxu0 %v2481_v29 }
  0x21   :  { %1991 = vmatprep.subr.mxu1 %v2306_v2  ;;  %1972 = vmatprep.subr.mxu0 %v2306_v2 }
  0x22   :  { %1992 = vmatpush3.msra.mxu1 %v2490_v30  ;;  %1973 = vmatpush3.msra.mxu0 %v2501_v31 }
  0x23   :  { %1993 = vmatprep.subr.mxu1 %v2306_v2  ;;  %1974 = vmatprep.subr.mxu0 %v2306_v2 }
  0x24   :  { %1994 = vmatpush3.msra.mxu1 %v2506_v32  ;;  %1975 = vmatpush3.msra.mxu0 %v2515_v33 }
  0x25   :  { %1995 = vmatprep.subr.mxu1 %v2306_v2  ;;  %1976 = vmatprep.subr.mxu0 %v2306_v2 }
  0x26   :  { %1996 = vmatpush3.msra.mxu1 %v2520_v34  ;;  %1977 = vmatpush3.msra.mxu0 %v2529_v35 }
  0x27   :  { %1997 = vmatprep.subr.mxu1 %v2306_v2  ;;  %1978 = vmatprep.subr.mxu0 %v2306_v2 }
  0x28   :  { %1998 = vmatpush3.msra.mxu1 %v2534_v36  ;;  %1979 = vmatpush3.msra.mxu0 %v2543_v37 }
  0x29   :  { %1999 = vmatprep.subr.mxu1 %v2306_v2  ;;  %1980 = vmatprep.subr.mxu0 %v2306_v2 }
  0x2a   :  { %2000 = vmatpush3.msra.mxu1 %v2548_v38  ;;  %1981 = vmatpush3.msra.mxu0 %v2555_v39 }
  0x2b   :  { %2023 = vmatprep.subr.mxu1 %v2306_v2  ;;  %2004 = vmatprep.subr.mxu0 %v2306_v2 }
  0x95   :  { %v349_v48 = vpop.permute.xlu0 %348 }
  0xcc   :  { %v101_v40 = vpop.f32.mrf.mxu0  ;;  %v180_v41 = vpop.f32.mrf.mxu1 }
  0xcd   :  { %v342_v46 = vmax.f32 %v101_v40, %v180_v41  ;;  %v2775_v40 = vld [vmem:[%s3111_s3 + $0x150] sm:$0xff] }
  0xce   :  { %v1926_v42 = vpop.f32.mrf.mxu0  ;;  %v1939_v43 = vpop.f32.mrf.mxu1  ;;  %v2784_v41 = vld [vmem:[%s3111_s3 + $0x110] sm:$0xff] }
  0xcf   :  { %v2789_v42 = vld [vmem:[%s3111_s3 + $0x148] sm:$0xff] }
  0xd0   :  { %v2798_v43 = vld [vmem:[%s3111_s3 + $0x108] sm:$0xff] }
  0xd8   :  { %v259_v44 = vpop.f32.mrf.mxu0  ;;  %v338_v45 = vpop.f32.mrf.mxu1 }
  0xd9   :  { %v343_v47 = vmax.f32 %v259_v44, %v338_v45  ;;  %v2803_v44 = vld [vmem:[%s3111_s3 + $0x140] sm:$0xff] }
  0xda   :  { %v1952_v49 = vpop.f32.mrf.mxu0  ;;  %v1965_v50 = vpop.f32.mrf.mxu1  ;;  %v2814_v45 = vld [vmem:[%s3111_s3 + $0x100] sm:$0xff] }
  0xdb   :  { %v344_v51 = vmax.f32 %v342_v46, %v343_v47  ;;  %v2822_v46 = vld [vmem:[%s3111_s3 + $0x1f8] sm:$0xff]  ;;  %v2850_v49 = vld [vmem:[%s3111_s3 + $0x1b0] sm:$0xff]  ;;  %v2855_v50 = vld [vmem:[%s3111_s3 + $0x1e8] sm:$0xff] }
  0xdc   :  { %v2834_v47 = vld [vmem:[%s3111_s3 + $0x1b8] sm:$0xff] }
  0xdd   :  { %v351_v52 = vadd.f32 %v349_v48, %v344_v51  ;;  %v2839_v48 = vld [vmem:[%s3111_s3 + $0x1f0] sm:$0xff]  ;;  %v2864_v51 = vld [vmem:[%s3111_s3 + $0x1a8] sm:$0xff] }
  0xdf   :  { %v2561_v53 = vmax.f32 %v351_v52, 0.0  ;;  %v2869_v52 = vld [vmem:[%s3111_s3 + $0x1e0] sm:$0xff] }
  0xe1   :  { %1097 = vrot.lane.b32.xlu1 %v2561_v53, %s2309_s15  ;;  %2002 = vmatmul.mubr.msk.f32.vlgmr.msra.gmra.mxu1 %vm373_vm3, %v2561_v53  ;;  %v372_v56 = vrot.slane %v2561_v53, 1  ;;  %v527_v58 = vrot.slane %v2561_v53, 2  ;;  %v610_v62 = vrot.slane %v2561_v53, 3  ;;  %v693_v0 = vrot.slane %v2561_v53, 4 }
  0xe2   :  { %2024 = vmatpush3.msra.mxu1 %v2566_v54  ;;  %2039 = vmatprep.mubr.msk.f32.mxu1 %vm2307_vm2, %v2306_v2  ;;  %v776_v5 = vrot.slane %v2561_v53, 5  ;;  %v3114_v7 = vrot.slane %v2561_v53, 6  ;;  %v3115_v11 = vrot.slane %v2561_v53, 7 }
  0xe3   :  { %2025 = vmatprep.subr.mxu1 %v2306_v2  ;;  %1023 = vrot.lane.b32.xlu0 %v372_v56, %s2309_s15 }
  0xe4   :  { %2026 = vmatpush3.msra.mxu1 %v2575_v55  ;;  %1983 = vmatmul.mubr.msk.f32.vlgmr.msra.gmra.mxu0 %vm373_vm3, %v372_v56  ;;  %v2878_v56 = vld [vmem:[%s3111_s3 + $0x1a0] sm:$0xff] }
  0xe5   :  { %2005 = vmatpush3.msra.mxu0 %v2582_v57  ;;  %2027 = vmatprep.subr.mxu1 %v2306_v2 }
  0xe6   :  { %2006 = vmatprep.subr.mxu0 %v2306_v2  ;;  %1171 = vrot.lane.b32.xlu1 %v527_v58, %s2309_s15 }
  0xe7   :  { %2007 = vmatpush3.msra.mxu0 %v2594_v59  ;;  %2028 = vmatpush3.msra.mxu1 %v2599_v60 }
  0xe8   :  { %2008 = vmatprep.subr.mxu0 %v2306_v2  ;;  %2029 = vmatprep.subr.mxu1 %v2306_v2 }
  0xe9   :  { %2030 = vmatpush3.msra.mxu1 %v2608_v61  ;;  %1246 = vrot.lane.b32.xlu0 %v610_v62, %s2309_s15 }
  0xea   :  { %2009 = vmatpush3.msra.mxu0 %v2616_v63  ;;  %2031 = vmatprep.subr.mxu1 %v2306_v2 }
  0xeb   :  { %2010 = vmatprep.subr.mxu0 %v2306_v2  ;;  %1321 = vrot.lane.b32.xlu1 %v693_v0, %s2309_s15 }
  0xec   :  { %2011 = vmatpush3.msra.mxu0 %v2626_v1  ;;  %2032 = vmatpush3.msra.mxu1 %v2631_v3 }
  0xed   :  { %2012 = vmatprep.subr.mxu0 %v2306_v2  ;;  %2033 = vmatprep.subr.mxu1 %v2306_v2 }
  0xee   :  { %2034 = vmatpush3.msra.mxu1 %v2642_v4  ;;  %1396 = vrot.lane.b32.xlu0 %v776_v5, %s2309_s15 }
  0xef   :  { %2013 = vmatpush3.msra.mxu0 %v2650_v6  ;;  %2035 = vmatprep.subr.mxu1 %v2306_v2 }
  0xf0   :  { %2014 = vmatprep.subr.mxu0 %v2306_v2  ;;  %1471 = vrot.lane.b32.xlu1 %v3114_v7, %s2309_s15  ;;  %v2911_v7 = vld [vmem:[%s3111_s3 + $0x1c8] sm:$0xff] }
  0xf1   :  { %2015 = vmatpush3.msra.mxu0 %v2662_v8  ;;  %2036 = vmatpush3.msra.mxu1 %v2667_v9  ;;  %3122 = vst [vmem:[#allocation7_spill] sm:$0xff] %v2911_v7 }
  0xf2   :  { %2016 = vmatprep.subr.mxu0 %v2306_v2  ;;  %2037 = vmatprep.subr.mxu1 %v2306_v2 }
  0xf3   :  { %2038 = vmatpush3.msra.mxu1 %v2678_v10  ;;  %1546 = vrot.lane.b32.xlu0 %v3115_v11, %s2309_s15  ;;  %v2920_v11 = vld [vmem:[%s3111_s3 + $0x188] sm:$0xff] }
  0xf4   :  { %2017 = vmatpush3.msra.mxu0 %v2686_v12  ;;  %2040 = vmatmul.mubr.msk.f32.vlgmr.msra.gmra.mxu1 %vm373_vm3, %v610_v62  ;;  %v2892_v62 = vld [vmem:[%s3111_s3 + $0x198] sm:$0xff]  ;;  %3123 = vst [vmem:[#allocation8_spill] sm:$0xff] %v2920_v11 }
  0xf5   :  { %2018 = vmatprep.subr.mxu0 %v2306_v2  ;;  %2061 = vmatprep.subr.mxu1 %v2306_v2 }
  0xf6   :  { %2019 = vmatpush3.msra.mxu0 %v2697_v13  ;;  %2020 = vmatprep.mubr.msk.f32.mxu0 %vm2307_vm2, %v2306_v2 }
  0xf7   :  { %2062 = vmatpush3.msra.mxu1 %v2704_v14  ;;  %2021 = vmatmul.mubr.msk.f32.vlgmr.msra.gmra.mxu0 %vm373_vm3, %v527_v58  ;;  %v2883_v58 = vld [vmem:[%s3111_s3 + $0x1d8] sm:$0xff] }
  0xf8   :  { %2042 = vmatprep.subr.mxu0 %v2306_v2  ;;  %2063 = vmatprep.subr.mxu1 %v2306_v2  ;;  %3120 = vst [vmem:[#allocation5_spill] sm:$0xff] %v2883_v58 }
  0xf9   :  { %2043 = vmatpush3.msra.mxu0 %v2714_v15  ;;  %2064 = vmatpush3.msra.mxu1 %v2719_v16 }
  0xfa   :  { %2044 = vmatprep.subr.mxu0 %v2306_v2  ;;  %2065 = vmatprep.subr.mxu1 %v2306_v2 }
  0xfb   :  { %2045 = vmatpush3.msra.mxu0 %v2728_v17  ;;  %2066 = vmatpush3.msra.mxu1 %v2733_v18 }
  0xfc   :  { %2046 = vmatprep.subr.mxu0 %v2306_v2  ;;  %2067 = vmatprep.subr.mxu1 %v2306_v2 }
  0xfd   :  { %2047 = vmatpush3.msra.mxu0 %v2742_v19  ;;  %2068 = vmatpush3.msra.mxu1 %v2747_v20 }
  0xfe   :  { %2048 = vmatprep.subr.mxu0 %v2306_v2  ;;  %2069 = vmatprep.subr.mxu1 %v2306_v2 }
  0xff   :  { %2049 = vmatpush3.msra.mxu0 %v2756_v21  ;;  %2070 = vmatpush3.msra.mxu1 %v2761_v22 }
 0x100   :  { %2050 = vmatprep.subr.mxu0 %v2306_v2  ;;  %2071 = vmatprep.subr.mxu1 %v2306_v2 }
 0x101   :  { %2051 = vmatpush3.msra.mxu0 %v2770_v23  ;;  %2072 = vmatpush3.msra.mxu1 %v2775_v40 }
 0x102   :  { %2052 = vmatprep.subr.mxu0 %v2306_v2  ;;  %2073 = vmatprep.subr.mxu1 %v2306_v2 }
 0x103   :  { %2053 = vmatpush3.msra.mxu0 %v2784_v41  ;;  %2074 = vmatpush3.msra.mxu1 %v2789_v42 }
 0x104   :  { %2054 = vmatprep.subr.mxu0 %v2306_v2  ;;  %2075 = vmatprep.subr.mxu1 %v2306_v2 }
 0x105   :  { %2055 = vmatpush3.msra.mxu0 %v2798_v43  ;;  %2076 = vmatpush3.msra.mxu1 %v2803_v44 }
 0x106   :  { %2077 = vmatprep.mubr.msk.f32.mxu1 %vm2307_vm2, %v2306_v2  ;;  %2056 = vmatprep.subr.mxu0 %v2306_v2 }
 0x107   :  { %2078 = vmatmul.mubr.msk.f32.vlgmr.msra.gmra.mxu1 %vm373_vm3, %v776_v5  ;;  %2099 = vmatprep.subr.mxu1 %v2306_v2  ;;  %v2906_v5 = vld [vmem:[%s3111_s3 + $0x190] sm:$0xff] }
 0x108   :  { %2057 = vmatpush3.msra.mxu0 %v2814_v45  ;;  %2058 = vmatprep.mubr.msk.f32.mxu0 %vm2307_vm2, %v2306_v2 }
 0x109   :  { %2100 = vmatpush3.msra.mxu1 %v2822_v46  ;;  %2059 = vmatmul.mubr.msk.f32.vlgmr.msra.gmra.mxu0 %vm373_vm3, %v693_v0  ;;  %v2897_v0 = vld [vmem:[%s3111_s3 + $0x1d0] sm:$0xff] }
 0x10a   :  { %2080 = vmatprep.subr.mxu0 %v2306_v2  ;;  %2101 = vmatprep.subr.mxu1 %v2306_v2  ;;  %3121 = vst [vmem:[#allocation6_spill] sm:$0xff] %v2897_v0 }
 0x10b   :  { %2081 = vmatpush3.msra.mxu0 %v2834_v47  ;;  %2102 = vmatpush3.msra.mxu1 %v2839_v48 }
 0x10c   :  { %2082 = vmatprep.subr.mxu0 %v2306_v2  ;;  %2103 = vmatprep.subr.mxu1 %v2306_v2 }
 0x10d   :  { %2083 = vmatpush3.msra.mxu0 %v2850_v49  ;;  %2104 = vmatpush3.msra.mxu1 %v2855_v50 }
 0x10e   :  { %2084 = vmatprep.subr.mxu0 %v2306_v2  ;;  %2105 = vmatprep.subr.mxu1 %v2306_v2 }
 0x10f   :  { %2085 = vmatpush3.msra.mxu0 %v2864_v51  ;;  %2106 = vmatpush3.msra.mxu1 %v2869_v52 }
 0x110   :  { %2086 = vmatprep.subr.mxu0 %v2306_v2  ;;  %2107 = vmatprep.subr.mxu1 %v2306_v2 }
 0x111   :  { %2087 = vmatpush3.msra.mxu0 %v2878_v56  ;;  %2108 = vmatpush3.msra.mxu1 %v2883_v58  ;;  %v2925_v58 = vld [vmem:[%s3111_s3 + $0x1c0] sm:$0xff] }
 0x112   :  { %2088 = vmatprep.subr.mxu0 %v2306_v2  ;;  %2109 = vmatprep.subr.mxu1 %v2306_v2 }
 0x113   :  { %2089 = vmatpush3.msra.mxu0 %v2892_v62  ;;  %2110 = vmatpush3.msra.mxu1 %v2897_v0  ;;  %v2934_v0 = vld [vmem:[%s3111_s3 + $0x180] sm:$0xff] }
 0x114   :  { %2090 = vmatprep.subr.mxu0 %v2306_v2  ;;  %2111 = vmatprep.subr.mxu1 %v2306_v2 }
 0x115   :  { %2091 = vmatpush3.msra.mxu0 %v2906_v5  ;;  %2112 = vmatpush3.msra.mxu1 %v2911_v7  ;;  %v3124_v7 = vrot.slane %v2561_v53, 7 }
 0x116   :  { %2092 = vmatprep.subr.mxu0 %v2306_v2  ;;  %2113 = vmatprep.subr.mxu1 %v2306_v2 }
 0x117   :  { %2093 = vmatpush3.msra.mxu0 %v2920_v11  ;;  %2114 = vmatpush3.msra.mxu1 %v2925_v58  ;;  %v3125_v11 = vrot.slane %v2561_v53, 6 }
 0x118   :  { %2115 = vmatprep.mubr.msk.f32.mxu1 %vm2307_vm2, %v2306_v2  ;;  %2094 = vmatprep.subr.mxu0 %v2306_v2 }
 0x119   :  { %2116 = vmatmul.mubr.msk.f32.vlgmr.msra.gmra.mxu1 %vm373_vm3, %v3124_v7  ;;  %2095 = vmatpush3.msra.mxu0 %v2934_v0 }
 0x11a   :  { %2096 = vmatprep.mubr.msk.f32.mxu0 %vm2307_vm2, %v2306_v2  ;;  %2137 = vmatprep.subr.mxu1 %v2306_v2 }
 0x11b   :  { %2097 = vmatmul.mubr.msk.f32.vlgmr.msra.gmra.mxu0 %vm373_vm3, %v3125_v11  ;;  %2138 = vmatpush3.msra.mxu1 %v2452_v24 }
 0x11c   :  { %2118 = vmatprep.subr.mxu0 %v2306_v2  ;;  %2139 = vmatprep.subr.mxu1 %v2306_v2 }
 0x11d   :  { %2119 = vmatpush3.msra.mxu0 %v2457_v25  ;;  %2140 = vmatpush3.msra.mxu1 %v2462_v26 }
 0x11e   :  { %2120 = vmatprep.subr.mxu0 %v2306_v2  ;;  %2141 = vmatprep.subr.mxu1 %v2306_v2 }
 0x11f   :  { %2121 = vmatpush3.msra.mxu0 %v2469_v27  ;;  %2142 = vmatpush3.msra.mxu1 %v2476_v28 }
 0x120   :  { %2122 = vmatprep.subr.mxu0 %v2306_v2  ;;  %2143 = vmatprep.subr.mxu1 %v2306_v2 }
 0x121   :  { %2123 = vmatpush3.msra.mxu0 %v2481_v29  ;;  %2144 = vmatpush3.msra.mxu1 %v2490_v30  ;;  %v3126_v30 = vld [vmem:[#allocation5_spill] sm:$0xff] }
 0x122   :  { %2124 = vmatprep.subr.mxu0 %v2306_v2  ;;  %2145 = vmatprep.subr.mxu1 %v2306_v2 }
 0x123   :  { %2125 = vmatpush3.msra.mxu0 %v2501_v31  ;;  %2146 = vmatpush3.msra.mxu1 %v2506_v32  ;;  %v3127_v31 = vld [vmem:[#allocation6_spill] sm:$0xff]  ;;  %v3128_v32 = vld [vmem:[#allocation7_spill] sm:$0xff] }
 0x124   :  { %2126 = vmatprep.subr.mxu0 %v2306_v2  ;;  %2147 = vmatprep.subr.mxu1 %v2306_v2 }
 0x125   :  { %2127 = vmatpush3.msra.mxu0 %v2515_v33  ;;  %2148 = vmatpush3.msra.mxu1 %v2520_v34  ;;  %v3129_v33 = vld [vmem:[#allocation8_spill] sm:$0xff] }
 0x126   :  { %2128 = vmatprep.subr.mxu0 %v2306_v2  ;;  %2149 = vmatprep.subr.mxu1 %v2306_v2 }
 0x127   :  { %2129 = vmatpush3.msra.mxu0 %v2529_v35  ;;  %2150 = vmatpush3.msra.mxu1 %v2534_v36 }
 0x128   :  { %2130 = vmatprep.subr.mxu0 %v2306_v2  ;;  %2151 = vmatprep.subr.mxu1 %v2306_v2 }
 0x129   :  { %2131 = vmatpush3.msra.mxu0 %v2543_v37  ;;  %2152 = vmatpush3.msra.mxu1 %v2548_v38 }
 0x12a   :  { %2132 = vmatprep.subr.mxu0 %v2306_v2  ;;  %2153 = vmatprep.mubr.msk.f32.mxu1 %vm2307_vm2, %v2306_v2 }
 0x12b   :  { %2175 = vmatprep.subr.mxu1 %v2306_v2  ;;  %2133 = vmatpush3.msra.mxu0 %v2555_v39 }
 0x12c   :  { %2134 = vmatprep.mubr.msk.f32.mxu0 %vm2307_vm2, %v2306_v2  ;;  %2156 = vmatprep.subr.mxu0 %v2306_v2 }
 0x153   :  { %v1098_v24 = vpop.permute.xlu1 %1097 }
 0x154   :  { %2154 = vmatmul.mubr.msk.f32.vlgmr.msra.gmra.mxu1 %vm373_vm3, %v1098_v24 }
 0x155   :  { %2176 = vmatpush3.msra.mxu1 %v2566_v54  ;;  %v1024_v25 = vpop.permute.xlu0 %1023  ;;  %2191 = vmatprep.mubr.msk.f32.mxu1 %vm2307_vm2, %v2306_v2 }
 0x156   :  { %2177 = vmatprep.subr.mxu1 %v2306_v2  ;;  %2135 = vmatmul.mubr.msk.f32.vlgmr.msra.gmra.mxu0 %vm373_vm3, %v1024_v25 }
 0x157   :  { %2157 = vmatpush3.msra.mxu0 %v2582_v57  ;;  %2178 = vmatpush3.msra.mxu1 %v2575_v55 }
 0x158   :  { %2158 = vmatprep.subr.mxu0 %v2306_v2  ;;  %2179 = vmatprep.subr.mxu1 %v2306_v2  ;;  %v1172_v27 = vpop.permute.xlu1 %1171 }
 0x159   :  { %2159 = vmatpush3.msra.mxu0 %v2594_v59  ;;  %2180 = vmatpush3.msra.mxu1 %v2599_v60 }
 0x15a   :  { %2181 = vmatprep.subr.mxu1 %v2306_v2  ;;  %2160 = vmatprep.subr.mxu0 %v2306_v2 }
 0x15b   :  { %2161 = vmatpush3.msra.mxu0 %v2616_v63  ;;  %2182 = vmatpush3.msra.mxu1 %v2608_v61  ;;  %v1247_v26 = vpop.permute.xlu0 %1246 }
 0x15c   :  { %2162 = vmatprep.subr.mxu0 %v2306_v2  ;;  %2183 = vmatprep.subr.mxu1 %v2306_v2 }
 0x15d   :  { %2163 = vmatpush3.msra.mxu0 %v2626_v1  ;;  %2184 = vmatpush3.msra.mxu1 %v2631_v3  ;;  %v1322_v29 = vpop.permute.xlu1 %1321 }
 0x15e   :  { %2185 = vmatprep.subr.mxu1 %v2306_v2  ;;  %2164 = vmatprep.subr.mxu0 %v2306_v2 }
 0x15f   :  { %2165 = vmatpush3.msra.mxu0 %v2650_v6  ;;  %2186 = vmatpush3.msra.mxu1 %v2642_v4 }
 0x160   :  { %2166 = vmatprep.subr.mxu0 %v2306_v2  ;;  %2187 = vmatprep.subr.mxu1 %v2306_v2  ;;  %v1397_v28 = vpop.permute.xlu0 %1396 }
 0x161   :  { %2167 = vmatpush3.msra.mxu0 %v2662_v8  ;;  %2188 = vmatpush3.msra.mxu1 %v2667_v9 }
 0x162   :  { %2189 = vmatprep.subr.mxu1 %v2306_v2  ;;  %2168 = vmatprep.subr.mxu0 %v2306_v2  ;;  %v1472_v35 = vpop.permute.xlu1 %1471 }
 0x163   :  { %2169 = vmatpush3.msra.mxu0 %v2686_v12  ;;  %2190 = vmatpush3.msra.mxu1 %v2678_v10 }
 0x164   :  { %2170 = vmatprep.subr.mxu0 %v2306_v2  ;;  %2192 = vmatmul.mubr.msk.f32.vlgmr.msra.gmra.mxu1 %vm373_vm3, %v1247_v26 }
 0x165   :  { %2213 = vmatprep.subr.mxu1 %v2306_v2  ;;  %2171 = vmatpush3.msra.mxu0 %v2697_v13  ;;  %v1547_v34 = vpop.permute.xlu0 %1546 }
 0x166   :  { %2172 = vmatprep.mubr.msk.f32.mxu0 %vm2307_vm2, %v2306_v2  ;;  %2214 = vmatpush3.msra.mxu1 %v2704_v14 }
 0x167   :  { %2173 = vmatmul.mubr.msk.f32.vlgmr.msra.gmra.mxu0 %vm373_vm3, %v1172_v27  ;;  %2194 = vmatprep.subr.mxu0 %v2306_v2 }
 0x168   :  { %2215 = vmatprep.subr.mxu1 %v2306_v2  ;;  %2195 = vmatpush3.msra.mxu0 %v2714_v15 }
 0x169   :  { %2216 = vmatpush3.msra.mxu1 %v2719_v16  ;;  %2196 = vmatprep.subr.mxu0 %v2306_v2 }
 0x16a   :  { %2217 = vmatprep.subr.mxu1 %v2306_v2  ;;  %2197 = vmatpush3.msra.mxu0 %v2728_v17 }
 0x16b   :  { %2218 = vmatpush3.msra.mxu1 %v2733_v18  ;;  %2198 = vmatprep.subr.mxu0 %v2306_v2 }
 0x16c   :  { %2219 = vmatprep.subr.mxu1 %v2306_v2  ;;  %2199 = vmatpush3.msra.mxu0 %v2742_v19 }
 0x16d   :  { %2220 = vmatpush3.msra.mxu1 %v2747_v20  ;;  %2200 = vmatprep.subr.mxu0 %v2306_v2 }
 0x16e   :  { %2221 = vmatprep.subr.mxu1 %v2306_v2  ;;  %2201 = vmatpush3.msra.mxu0 %v2756_v21 }
 0x16f   :  { %2222 = vmatpush3.msra.mxu1 %v2761_v22  ;;  %2202 = vmatprep.subr.mxu0 %v2306_v2 }
 0x170   :  { %2223 = vmatprep.subr.mxu1 %v2306_v2  ;;  %2203 = vmatpush3.msra.mxu0 %v2770_v23 }
 0x171   :  { %2224 = vmatpush3.msra.mxu1 %v2775_v40  ;;  %2204 = vmatprep.subr.mxu0 %v2306_v2 }
 0x172   :  { %2225 = vmatprep.subr.mxu1 %v2306_v2  ;;  %2205 = vmatpush3.msra.mxu0 %v2784_v41 }
 0x173   :  { %2226 = vmatpush3.msra.mxu1 %v2789_v42  ;;  %2206 = vmatprep.subr.mxu0 %v2306_v2 }
 0x174   :  { %2227 = vmatprep.subr.mxu1 %v2306_v2  ;;  %2207 = vmatpush3.msra.mxu0 %v2798_v43 }
 0x175   :  { %2228 = vmatpush3.msra.mxu1 %v2803_v44  ;;  %2229 = vmatprep.mubr.msk.f32.mxu1 %vm2307_vm2, %v2306_v2 }
 0x176   :  { %2208 = vmatprep.subr.mxu0 %v2306_v2  ;;  %2230 = vmatmul.mubr.msk.f32.vlgmr.msra.gmra.mxu1 %vm373_vm3, %v1397_v28 }
 0x177   :  { %2251 = vmatprep.subr.mxu1 %v2306_v2  ;;  %2209 = vmatpush3.msra.mxu0 %v2814_v45  ;;  %v353_v45 = vld [vmem:[%s3112_s4] sm:$0x1]  ;;  %s2310_s4 = smov [#allocation2]  }
 0x178   :  { %2210 = vmatprep.mubr.msk.f32.mxu0 %vm2307_vm2, %v2306_v2  ;;  %2252 = vmatpush3.msra.mxu1 %v2822_v46  ;;  %s1641_s26 = sshll.u32 %s2310_s4, 4  ;;  %s1642_s26 = int_to_ptr.vmem [resolvable:$true] %s1641_s26 }
 0x179   :  { %2211 = vmatmul.mubr.msk.f32.vlgmr.msra.gmra.mxu0 %vm373_vm3, %v1322_v29  ;;  %2232 = vmatprep.subr.mxu0 %v2306_v2  ;;  %s2284_s27 = scalar_lea.vmem %s1642_s26, 32  ;;  %p2289_p1 = scmp.lt.s32.totalorder %s1642_s26, %s1642_s26 }
 0x17a   :  { %2253 = vmatprep.subr.mxu1 %v2306_v2  ;;  %2233 = vmatpush3.msra.mxu0 %v2834_v47  ;;  %p2285_p0 = scmp.ne.s32.totalorder %s1642_s26, %s2284_s27  ;;  %p2290_p2 = scmp.lt.s32.totalorder %s2284_s27, %s2284_s27 }
 0x17b   :  { %2254 = vmatpush3.msra.mxu1 %v2839_v48  ;;  %2234 = vmatprep.subr.mxu0 %v2306_v2 }
 0x17c   :  { %2255 = vmatprep.subr.mxu1 %v2306_v2  ;;  %2235 = vmatpush3.msra.mxu0 %v2850_v49  ;;  %p2291_p3 = por %p2290_p2, %p2289_p1 }
 0x17d   :  { %2256 = vmatpush3.msra.mxu1 %v2855_v50  ;;  %2236 = vmatprep.subr.mxu0 %v2306_v2 }
 0x17e   :  { %2257 = vmatprep.subr.mxu1 %v2306_v2  ;;  %2237 = vmatpush3.msra.mxu0 %v2864_v51  ;;  %p2292_p4 = pnand %p2291_p3, %p2285_p0 }
 0x17f   :  { %2258 = vmatpush3.msra.mxu1 %v2869_v52  ;;  %2238 = vmatprep.subr.mxu0 %v2306_v2 }
 0x180   :  { %2259 = vmatprep.subr.mxu1 %v2306_v2  ;;  %2239 = vmatpush3.msra.mxu0 %v2878_v56 }
 0x181   :  { %2260 = vmatpush3.msra.mxu1 %v3126_v30  ;;  %2240 = vmatprep.subr.mxu0 %v2306_v2 }
 0x182   :  { %2261 = vmatprep.subr.mxu1 %v2306_v2  ;;  %2241 = vmatpush3.msra.mxu0 %v2892_v62 }
 0x183   :  { %2262 = vmatpush3.msra.mxu1 %v3127_v31  ;;  %2242 = vmatprep.subr.mxu0 %v2306_v2 }
 0x184   :  { %2263 = vmatprep.subr.mxu1 %v2306_v2  ;;  %2243 = vmatpush3.msra.mxu0 %v2906_v5 }
 0x185   :  { %2264 = vmatpush3.msra.mxu1 %v3128_v32  ;;  %2244 = vmatprep.subr.mxu0 %v2306_v2 }
 0x186   :  { %2265 = vmatprep.subr.mxu1 %v2306_v2  ;;  %2245 = vmatpush3.msra.mxu0 %v3129_v33 }
 0x187   :  { %2266 = vmatpush3.msra.mxu1 %v2925_v58  ;;  %2267 = vmatprep.mubr.msk.f32.mxu1 %vm2307_vm2, %v2306_v2 }
 0x188   :  { %2246 = vmatprep.subr.mxu0 %v2306_v2  ;;  %2268 = vmatmul.mubr.msk.f32.vlgmr.msra.gmra.mxu1 %vm373_vm3, %v1547_v34 }
 0x189   :  { %2247 = vmatpush3.msra.mxu0 %v2934_v0  ;;  %2248 = vmatprep.mubr.msk.f32.mxu0 %vm2307_vm2, %v2306_v2 }
 0x18a   :  { %2249 = vmatmul.mubr.msk.f32.vlgmr.msra.gmra.mxu0 %vm373_vm3, %v1472_v35 }
 0x1a1   :  { %v514_v36 = vpop.f32.mrf.mxu1 }
 0x1a3   :  { %v2003_v37 = vpop.f32.mrf.mxu1 }
 0x1a4   :  { %v442_v38 = vpop.f32.mrf.mxu0 }
 0x1a5   :  { %v515_v39 = vadd.f32 %v514_v36, %v442_v38 }
 0x1a6   :  { %v1984_v53 = vpop.f32.mrf.mxu0 }
 0x1b4   :  { %v679_v54 = vpop.f32.mrf.mxu1 }
 0x1b6   :  { %v2041_v55 = vpop.f32.mrf.mxu1 }
 0x1b7   :  { %v596_v57 = vpop.f32.mrf.mxu0 }
 0x1b8   :  { %v600_v59 = vadd.f32 %v596_v57, %v515_v39 }
 0x1b9   :  { %v2022_v60 = vpop.f32.mrf.mxu0 }
 0x1ba   :  { %v683_v61 = vadd.f32 %v679_v54, %v600_v59 }
 0x1c7   :  { %v845_v63 = vpop.f32.mrf.mxu1 }
 0x1c9   :  { %v762_v1 = vpop.f32.mrf.mxu0  ;;  %v2079_v3 = vpop.f32.mrf.mxu1 }
 0x1ca   :  { %v766_v4 = vadd.f32 %v762_v1, %v683_v61 }
 0x1cb   :  { %v2060_v6 = vpop.f32.mrf.mxu0 }
 0x1cc   :  { %v849_v7 = vadd.f32 %v845_v63, %v766_v4 }
 0x1d9   :  { %v1011_v2 = vpop.f32.mrf.mxu1 }
 0x1db   :  { %v928_v8 = vpop.f32.mrf.mxu0  ;;  %v2117_v9 = vpop.f32.mrf.mxu1 }
 0x1dc   :  { %v932_v10 = vadd.f32 %v928_v8, %v849_v7 }
 0x1dd   :  { %v2098_v11 = vpop.f32.mrf.mxu0 }
 0x1de   :  { %v1015_v12 = vadd.f32 %v1011_v2, %v932_v10 }
 0x1e0   :  { %v1016_v47 = vadd.f32 %v1015_v12, %v353_v45 }
 0x1e2   :  { %v1736_v56 = vmul.f32 -1.442695, %v1016_v47 }
 0x1e4   :  { %2276 = vpow2.f32 %v1736_v56 }
 0x1f1   :  { %v2277_v5 = vpop.eup %2276 }
 0x1f2   :  { %v1020_v25 = vadd.f32 1.0, %v2277_v5 }
 0x214   :  { %v1167_v13 = vpop.f32.mrf.mxu1 }
 0x216   :  { %v1093_v14 = vpop.f32.mrf.mxu0  ;;  %v2155_v15 = vpop.f32.mrf.mxu1 }
 0x217   :  { %v1168_v41 = vadd.f32 %v1167_v13, %v1093_v14 }
 0x218   :  { %v2136_v16 = vpop.f32.mrf.mxu0 }
 0x224   :  { %v1316_v17 = vpop.f32.mrf.mxu1 }
 0x226   :  { %v2193_v18 = vpop.f32.mrf.mxu1 }
 0x227   :  { %v1241_v19 = vpop.f32.mrf.mxu0 }
 0x228   :  { %v1245_v42 = vadd.f32 %v1241_v19, %v1168_v41 }
 0x229   :  { %v2174_v20 = vpop.f32.mrf.mxu0 }
 0x22a   :  { %v1320_v43 = vadd.f32 %v1316_v17, %v1245_v42 }
 0x236   :  { %v1466_v21 = vpop.f32.mrf.mxu1 }
 0x238   :  { %v2231_v22 = vpop.f32.mrf.mxu1 }
 0x239   :  { %v1391_v23 = vpop.f32.mrf.mxu0 }
 0x23a   :  { %v1395_v44 = vadd.f32 %v1391_v23, %v1320_v43 }
 0x23b   :  { %v2212_v40 = vpop.f32.mrf.mxu0 }
 0x23c   :  { %v1470_v48 = vadd.f32 %v1466_v21, %v1395_v44 }
 0x248   :  { %v1616_v46 = vpop.f32.mrf.mxu1 }
 0x24a   :  { %v1541_v49 = vpop.f32.mrf.mxu0  ;;  %v2269_v50 = vpop.f32.mrf.mxu1 }
 0x24b   :  { %v1545_v51 = vadd.f32 %v1541_v49, %v1470_v48 }
 0x24c   :  { %v2250_v52 = vpop.f32.mrf.mxu0 }
 0x24d   :  { %v1620_v58 = vadd.f32 %v1616_v46, %v1545_v51 }
 0x24f   :  { %v1621_v62 = vadd.f32 %v1620_v58, %v353_v45 }
 0x251   :  { %v1745_v0 = vmul.f32 -1.442695, %v1621_v62 }
 0x253   :  { %2278 = vpow2.f32 %v1745_v0 }
 0x260   :  { %v2279_v24 = vpop.eup %2278 }
 0x261   :  { %v1625_v26 = vadd.f32 1.0, %v2279_v24 }
 0x263   :  { %2280 = vrcp.f32 %v1625_v26 }
 0x264   :  { %2282 = vrcp.f32 %v1020_v25 }
 0x270   :  { %v2281_v27 = vpop.eup %2280 }
 0x271   :  { %v1629_v28 = vrot.slane %v2281_v27, 7  ;;  %v2283_v29 = vpop.eup %2282 }
 0x273   :  { %v1632_v30 = vsel %vm1631_vm4, %v2283_v29, %v1629_v28 }
 0x274   :  { %1634 = vst.msk [vmem:[#allocation2] sm:$0x3] %vm1633_vm5, %v1632_v30 }
 0x275   :  { %2295 = shalt.err (!%p2292_p4)
}
 0x276   :  { %1644 = dma.vmem_to_hbm [thread:$0]  %s1642_s26, 32, %s3113_s5, [#allocation3]  }
 0x277   :  { %2304 = dma.done.wait [#allocation3], 32  }
 0x278   :  { %2305 = vsyncadd [#allocation3], 4294967264 }
 0x279   :  { %1648 = vsyncpa [#allocation3], 1 }

</bundles_post_ra>
